<compile_context>
chip_gen: v5e
topology: v5e:2x2
jax: 0.10.0
libtpu: 0.0.40
codegen_flags: <defaults>
</compile_context>

<pallas_src>
import functools

import jax
import jax.numpy as jnp
from jax.experimental import pallas as pl
from jax.experimental.pallas import tpu as pltpu


class _DoesNotFit(Exception):
    """Fused-weight path does not fit the VMEM budget; use the K-tiled path."""


def _round_up(x, m):
    return (x + m - 1) // m * m


def _sublane(dtype):
    return {4: 8, 2: 16, 1: 32}.get(jnp.dtype(dtype).itemsize, 8)


def _vmem_limits(tuned):
    """(tile-picker budget bytes, compiler vmem_limit_bytes) — generation-aware."""
    if not tuned:
        return 24 << 20, 40 << 20            # conservative: fits every generation
    phys = None
    try:
        info = pltpu.get_tpu_info()
        phys = int(getattr(info, "vmem_capacity_bytes", 0)) or None
    except Exception:
        phys = None
    if phys is None:
        phys = 64 << 20                      # assume v7x-like per-core VMEM if unknown
    limit = min(int(phys * 0.75), phys - (8 << 20))
    limit = max(limit, 32 << 20)
    return int(limit * 0.85), limit          # picker budget leaves headroom under the limit


def _weight_pipeline_kwargs(tuned):
    # Grid-invariant operands never re-DMA; Buffered(1) drops their second pipeline buffer.
    return dict(pipeline_mode=pl.Buffered(1)) if tuned else {}


def _pick_tile_b(batch, per_row_bytes, rows_budget_bytes, sublane):
    tile_max = rows_budget_bytes // max(per_row_bytes, 1)
    tile_max = max(sublane, min(1024, int(tile_max)))
    tile_max = (tile_max // sublane) * sublane
    if batch >= 512:
        # keep >= 2 grid steps so both v7x TensorCores get work
        tile_max = min(tile_max, _round_up(pl.cdiv(batch, 2), sublane))
    if batch <= tile_max:
        return _round_up(batch, sublane)
    n_tiles = pl.cdiv(batch, tile_max)                    # minimize batch padding
    tile = _round_up(pl.cdiv(batch, n_tiles), sublane)
    if tile > 256:
        t = _round_up(tile, 256)                          # fill the 256-wide MXU M dim
        if t <= tile_max:
            tile = t
    return max(sublane, min(tile, tile_max))


def _build_col_groups(w1, b1, w2, ws, bs, out_c, out_p, compute_dtype, include_skip):
    """Pre-transposed, lane-padded fused weights: columns are (a | b [| skip]) groups."""
    def pad_cols(w_t):                                    # [in_c, out_c] -> [in_c, out_p]
        return jnp.pad(w_t, ((0, 0), (0, out_p - out_c)))

    def pad_vec(v):
        return jnp.pad(v, (0, out_p - out_c))

    cols = [pad_cols(w1[:out_c, :].T), pad_cols(w1[out_c:, :].T)]
    bias = [pad_vec(b1[:out_c]), pad_vec(b1[out_c:])]
    if include_skip:
        cols.append(pad_cols(ws.T))
        bias.append(pad_vec(bs))
    wcat = jnp.concatenate(cols, axis=1).astype(compute_dtype)        # [in_c, ncols]
    bcat = jnp.concatenate(bias).reshape(1, -1).astype(jnp.float32)   # [1, ncols]
    w2t = jnp.pad(w2.T, ((0, out_p - out_c), (0, out_p - out_c))).astype(compute_dtype)
    return wcat, bcat, w2t


# ----------------------------------------------------------------------------- fused kernel
def _make_fused_kernel(n_inputs, out_p, out_c, identity_skip, compute_dtype):
    def kernel(*refs):
        xs = refs[:n_inputs]
        ws = refs[n_inputs:2 * n_inputs]
        bcat_ref = refs[2 * n_inputs]
        w2t_ref = refs[2 * n_inputs + 1]
        o_ref = refs[2 * n_inputs + 2]

        # One wide MXU pass per input row-group over lane-aligned (a | b [| skip]) columns.
        acc = jnp.dot(xs[0][...].astype(compute_dtype), ws[0][...],
                      preferred_element_type=jnp.float32)
        for x_ref, w_ref in zip(xs[1:], ws[1:]):
            acc = acc + jnp.dot(x_ref[...].astype(compute_dtype), w_ref[...],
                                preferred_element_type=jnp.float32)
        h = acc + bcat_ref[...]

        a = h[:, :out_p]
        b = h[:, out_p:2 * out_p]
        gated = a * jax.nn.sigmoid(b)                     # f32 gating (VPU/EUP), lane aligned
        main = jnp.dot(gated.astype(compute_dtype), w2t_ref[...],
                       preferred_element_type=jnp.float32)

        if identity_skip:
            # Add x directly: exact skip, no identity-matmul rounding, no skip weight group.
            parts = [x_ref[...].astype(jnp.float32) for x_ref in xs]
            skip = parts[0] if len(parts) == 1 else jnp.concatenate(parts, axis=1)
            if out_c != out_p:
                skip = jnp.concatenate(
                    [skip, jnp.zeros((skip.shape[0], out_p - out_c), jnp.float32)], axis=1)
        else:
            skip = h[:, 2 * out_p:]
        o_ref[...] = (main + skip).astype(o_ref.dtype)

    return kernel


def _call_fused(xs, w1, b1, w2, ws, bs, out_dtype, out_c, out_p, identity_skip,
                compute_dtype, tuned, cost):
    c_list = [int(a.shape[1]) for a in xs]
    in_c = sum(c_list)
    B = int(xs[0].shape[0])
    ncols = (2 if identity_skip else 3) * out_p
    c_item = jnp.dtype(compute_dtype).itemsize
    x_item = jnp.dtype(xs[0].dtype).itemsize
    o_item = jnp.dtype(out_dtype).itemsize
    sub = max(_sublane(compute_dtype), _sublane(xs[0].dtype), _sublane(out_dtype))

    budget, vmem_limit = _vmem_limits(tuned)
    wmult = 1 if tuned else 2                             # Buffered(1) vs default double-buffer
    w_bytes = wmult * ((in_c * ncols + out_p * out_p) * c_item + ncols * 4)
    per_row = (2 * in_c * x_item                          # double-buffered x tiles
               + 2 * out_p * o_item                       # double-buffered out tile
               + in_c * c_item                            # in-kernel compute-dtype cast of x
               + ncols * 4                                # h (f32)
               + out_p * (4 + c_item)                     # gated f32 + compute-dtype copy
               + 2 * out_p * 4)                           # main + skip (f32)
    rows_budget = budget - w_bytes
    if rows_budget < sub * per_row:
        raise _DoesNotFit()

    tile_b = _pick_tile_b(B, per_row, rows_budget, sub)
    b_pad = _round_up(B, tile_b)
    if b_pad != B:
        xs = [jnp.pad(a, ((0, b_pad - B), (0, 0))) for a in xs]

    wcat, bcat, w2t = _build_col_groups(w1, b1, w2, ws, bs, out_c, out_p, compute_dtype,
                                        include_skip=not identity_skip)
    # Split the fused weight rows per input so x never needs a wrapper-side concat.
    w_groups, off = [], 0
    for c in c_list:
        w_groups.append(wcat[off:off + c])
        off += c

    wkw = _weight_pipeline_kwargs(tuned)
    in_specs = []
    for c in c_list:
        in_specs.append(pl.BlockSpec((tile_b, c), lambda i: (i, 0)))
    for c in c_list:
        in_specs.append(pl.BlockSpec((c, ncols), lambda i: (0, 0), **wkw))
    in_specs.append(pl.BlockSpec((1, ncols), lambda i: (0, 0), **wkw))
    in_specs.append(pl.BlockSpec((out_p, out_p), lambda i: (0, 0), **wkw))

    return pl.pallas_call(
        _make_fused_kernel(len(xs), out_p, out_c, identity_skip, compute_dtype),
        out_shape=jax.ShapeDtypeStruct((b_pad, out_p), out_dtype),
        grid=(b_pad // tile_b,),
        in_specs=in_specs,
        out_specs=pl.BlockSpec((tile_b, out_p), lambda i: (i, 0)),
        compiler_params=pltpu.CompilerParams(
            dimension_semantics=("parallel",),
            vmem_limit_bytes=vmem_limit),
        cost_estimate=cost,
    )(*xs, *w_groups, bcat, w2t)


# --------------------------------------------------------------------------- K-tiled kernel
def _ktiled_kernel(x_ref, wcat_ref, bcat_ref, w2t_ref, o_ref, acc_ref, *, out_p,
                   compute_dtype):
    k = pl.program_id(1)

    @pl.when(k == 0)
    def _():
        acc_ref[...] = jnp.zeros_like(acc_ref)

    acc_ref[...] += jnp.dot(x_ref[...].astype(compute_dtype), wcat_ref[...],
                            preferred_element_type=jnp.float32)

    @pl.when(k == pl.num_programs(1) - 1)
    def _():
        h = acc_ref[...] + bcat_ref[...]
        a = h[:, :out_p]
        b = h[:, out_p:2 * out_p]
        gated = a * jax.nn.sigmoid(b)
        main = jnp.dot(gated.astype(compute_dtype), w2t_ref[...],
                       preferred_element_type=jnp.float32)
        o_ref[...] = (main + h[:, 2 * out_p:]).astype(o_ref.dtype)


def _call_ktiled(xs, w1, b1, w2, ws, bs, out_dtype, out_c, out_p, identity_skip,
                 compute_dtype, tuned, cost):
    # Fallback for large in_c (fused weight cannot stay resident). Identity skip is folded
    # as an eye() column group here (rare path); with bf16 compute the skip is bf16-rounded.
    if ws is None:
        ws = jnp.eye(out_c, dtype=w1.dtype)
        bs = jnp.zeros((out_c,), w1.dtype)
    x = xs[0] if len(xs) == 1 else jnp.concatenate(xs, axis=1)
    B, in_c = int(x.shape[0]), int(x.shape[1])
    ncols = 3 * out_p
    c_item = jnp.dtype(compute_dtype).itemsize
    x_item = jnp.dtype(x.dtype).itemsize
    o_item = jnp.dtype(out_dtype).itemsize
    sub = max(_sublane(compute_dtype), _sublane(x.dtype), _sublane(out_dtype))

    budget, vmem_limit = _vmem_limits(tuned)
    wmult = 1 if tuned else 2
    tile_b = min(_round_up(B, sub), 256)

    fixed = (wmult * (out_p * out_p * c_item + ncols * 4)   # resident W2^T + bias
             + tile_b * ncols * 4                            # f32 accumulator scratch
             + 2 * tile_b * out_p * o_item                   # double-buffered out tile
             + tile_b * (3 * out_p * 4 + out_p * c_item))    # gate/main temporaries
    per_tk = 2 * (tile_b * x_item + ncols * c_item) + tile_b * c_item
    tk_max = (budget - fixed) // max(per_tk, 1)
    tk_max = (int(tk_max) // 128) * 128
    if tk_max < 128:
        raise ValueError(
            "ResnetBlock weights too large for VMEM even with K tiling "
            f"(out_p={out_p}); reduce out_channels or raise the VMEM budget.")
    n_k = pl.cdiv(_round_up(in_c, 128), tk_max)
    tk = _round_up(pl.cdiv(in_c, n_k), 128)
    in_c_p = n_k * tk
    b_pad = _round_up(B, tile_b)

    x = jnp.pad(x, ((0, b_pad - B), (0, in_c_p - in_c)))
    wcat, bcat, w2t = _build_col_groups(w1, b1, w2, ws, bs, out_c, out_p, compute_dtype,
                                        include_skip=True)
    wcat = jnp.pad(wcat, ((0, in_c_p - in_c), (0, 0)))       # zero rows: matmul unchanged

    wkw = _weight_pipeline_kwargs(tuned)
    kernel = functools.partial(_ktiled_kernel, out_p=out_p, compute_dtype=compute_dtype)
    return pl.pallas_call(
        kernel,
        out_shape=jax.ShapeDtypeStruct((b_pad, out_p), out_dtype),
        grid=(b_pad // tile_b, in_c_p // tk),
        in_specs=[
            pl.BlockSpec((tile_b, tk), lambda i, k: (i, k)),
            pl.BlockSpec((tk, ncols), lambda i, k: (k, 0)),
            pl.BlockSpec((1, ncols), lambda i, k: (0, 0), **wkw),
            pl.BlockSpec((out_p, out_p), lambda i, k: (0, 0), **wkw),
        ],
        out_specs=pl.BlockSpec((tile_b, out_p), lambda i, k: (i, 0)),
        scratch_shapes=[pltpu.VMEM((tile_b, ncols), jnp.float32)],
        compiler_params=pltpu.CompilerParams(
            dimension_semantics=("parallel", "arbitrary"),
            vmem_limit_bytes=vmem_limit),
        cost_estimate=cost,
    )(x, wcat, bcat, w2t)


# ------------------------------------------------------------------------------- public API
def init_resnet_block_params(key, in_channels, out_channels, in_channels_cond=0):
    """Deterministic parameter init matching the PyTorch module's shapes."""
    in_c = in_channels + in_channels_cond
    k1, k2, k3, k4, k5 = jax.random.split(key, 5)
    params = {
        "w1": jax.random.normal(k1, (2 * out_channels, in_c), jnp.float32) * 0.1,
        "b1": jax.random.normal(k2, (2 * out_channels,), jnp.float32) * 0.1,
        "w2": jax.random.normal(k3, (out_channels, out_channels), jnp.float32) * 0.1,
    }
    if in_c != out_channels:
        params["ws"] = jax.random.normal(k4, (out_channels, in_c), jnp.float32) * 0.1
        params["bs"] = jax.random.normal(k5, (out_channels,), jnp.float32) * 0.1
    return params


def resnet_block_forward(params, x, *additional_input, compute_dtype=None,
                         force_k_tiled=False):
    """Fused ResnetBlock forward. compute_dtype (e.g. jnp.bfloat16 on v6e/v7x) sets the MXU
    operand dtype; gating/bias/accumulation always stay f32. Defaults to x.dtype."""
    xs = [x] + [jnp.asarray(a) for a in additional_input]
    B = int(x.shape[0])
    in_c = sum(int(a.shape[1]) for a in xs)
    w1, b1, w2 = params["w1"], params["b1"], params["w2"]
    out_c = int(w2.shape[0])
    assert w1.shape == (2 * out_c, in_c), (w1.shape, in_c, out_c)

    identity_skip = "ws" not in params
    if identity_skip:
        assert in_c == out_c, f"identity skip needs in_c == out_c, got {in_c} vs {out_c}"
        ws = bs = None
    else:
        ws, bs = params["ws"], params["bs"]
        assert ws.shape == (out_c, in_c) and bs.shape == (out_c,)

    cdt = compute_dtype if compute_dtype is not None else x.dtype
    out_dtype = x.dtype
    out_p = max(_round_up(out_c, 128), 128)

    cost = pl.CostEstimate(
        flops=int(2 * B * in_c * 3 * out_p + 2 * B * out_p * out_p),
        transcendentals=int(B * out_p),
        bytes_accessed=int(B * in_c * jnp.dtype(x.dtype).itemsize
                           + B * out_c * jnp.dtype(out_dtype).itemsize
                           + (in_c * 3 * out_p + out_p * out_p) * jnp.dtype(cdt).itemsize))

    def run(tuned):
        if not force_k_tiled:
            try:
                return _call_fused(xs, w1, b1, w2, ws, bs, out_dtype, out_c, out_p,
                                   identity_skip, cdt, tuned, cost)
            except _DoesNotFit:
                pass
        return _call_ktiled(xs, w1, b1, w2, ws, bs, out_dtype, out_c, out_p,
                            identity_skip, cdt, tuned, cost)

    try:
        out = run(True)      # Buffered(1) weights + generation-tuned VMEM / tile sizes
    except Exception:
        out = run(False)     # conservative pipelining / VMEM settings (portability net)

    if out.shape == (B, out_c):
        return out           # already lane-exact: skip the slice copy
    return out[:B, :out_c]


def resnet_block_reference(params, x, *additional_input):
    """Pure-JAX reference for correctness check."""
    if additional_input:
        x = jnp.concatenate((x,) + tuple(additional_input), axis=1)
    out_c = params["w2"].shape[0]
    h = x @ params["w1"].T + params["b1"]
    a, b = h[:, :out_c], h[:, out_c:]
    g = a * jax.nn.sigmoid(b)
    main = g @ params["w2"].T
    if "ws" in params:
        skip = x @ params["ws"].T + params["bs"]
    else:
        skip = x
    return main + skip


if __name__ == "__main__":
    key = jax.random.PRNGKey(0)
    kx, kc, kp = jax.random.split(key, 3)

    batch = 8
    in_channels = 32
    in_channels_cond = 8
    out_channels = 16

    x = jax.random.normal(kx, (batch, in_channels), jnp.float32)
    cond = jax.random.normal(kc, (batch, in_channels_cond), jnp.float32)
    params = init_resnet_block_params(kp, in_channels, out_channels, in_channels_cond)
    ref = resnet_block_reference(params, x, cond)

    # f32 fused path (conditioned input, linear skip)
    out = jax.block_until_ready(resnet_block_forward(params, x, cond))
    assert out.shape == (batch, out_channels), out.shape
    assert jnp.allclose(out, ref, atol=2e-5, rtol=2e-5), "mismatch vs reference"

    # identity-skip path (in_c == out_c, skip added directly in-kernel)
    params_id = init_resnet_block_params(kp, out_channels, out_channels)
    x_id = jax.random.normal(kx, (batch, out_channels), jnp.float32)
    out_id = jax.block_until_ready(resnet_block_forward(params_id, x_id))
    ref_id = resnet_block_reference(params_id, x_id)
    assert jnp.allclose(out_id, ref_id, atol=2e-5, rtol=2e-5), "identity-skip mismatch"

    # bf16 compute path (recommended on v6e/v7x): bf16 MXU operands, f32 gating/accum
    out_bf16 = jax.block_until_ready(
        resnet_block_forward(params, x, cond, compute_dtype=jnp.bfloat16))
    assert jnp.allclose(out_bf16, ref, atol=5e-2, rtol=5e-2), "bf16 mismatch"

    # K-tiled fallback path (selected automatically when fused weights exceed VMEM)
    out_kt = jax.block_until_ready(
        resnet_block_forward(params, x, cond, force_k_tiled=True))
    assert jnp.allclose(out_kt, ref, atol=1e-4, rtol=1e-4), "k-tiled mismatch"

    print("KERNEL_OK")
</pallas_src>

<mosaic_0001>
module attributes {stable_mosaic.version = 11 : i64} {
  func.func @kernel(%arg0: i32, %arg1: memref<8x32xf32, #tpu.memory_space<vmem>>, %arg2: memref<8x8xf32, #tpu.memory_space<vmem>>, %arg3: memref<32x384xf32, #tpu.memory_space<vmem>>, %arg4: memref<8x384xf32, #tpu.memory_space<vmem>>, %arg5: memref<1x384xf32, #tpu.memory_space<vmem>>, %arg6: memref<128x128xf32, #tpu.memory_space<vmem>>, %arg7: memref<8x128xf32, #tpu.memory_space<vmem>>) attributes {dimension_semantics = [#tpu.dimension_semantics<parallel>], iteration_bounds = array<i64: 1>, scalar_prefetch = 0 : i64, scratch_operands = 0 : i64, tpu.core_type = #tpu.core_type<tc>, window_params = [{transform_indices = @transform_0, window_bounds = array<i64: 8, 32>}, {transform_indices = @transform_1, window_bounds = array<i64: 8, 8>}, {pipeline_mode = #tpu.pipeline_mode<synchronous>, transform_indices = @transform_2, window_bounds = array<i64: 32, 384>}, {pipeline_mode = #tpu.pipeline_mode<synchronous>, transform_indices = @transform_3, window_bounds = array<i64: 8, 384>}, {pipeline_mode = #tpu.pipeline_mode<synchronous>, transform_indices = @transform_4, window_bounds = array<i64: 1, 384>}, {pipeline_mode = #tpu.pipeline_mode<synchronous>, transform_indices = @transform_5, window_bounds = array<i64: 128, 128>}, {transform_indices = @transform_6, window_bounds = array<i64: 8, 128>}]} {
    %c0 = arith.constant 0 : index
    %c0_0 = arith.constant 0 : index
    %0 = vector.load %arg1[%c0, %c0_0] : memref<8x32xf32, #tpu.memory_space<vmem>>, vector<8x32xf32>
    %c0_1 = arith.constant 0 : index
    %c0_2 = arith.constant 0 : index
    %1 = vector.load %arg3[%c0_1, %c0_2] : memref<32x384xf32, #tpu.memory_space<vmem>>, vector<32x384xf32>
    %cst = arith.constant dense<0.000000e+00> : vector<8x384xf32>
    %2 = tpu.matmul %0, %1, %cst {dimension_numbers = #tpu.dot_dimension_numbers<[1], [0], [0], [1], [0, 0, 1, 1], [], []>} : vector<8x32xf32>, vector<32x384xf32>, vector<8x384xf32> -> vector<8x384xf32>
    %c0_3 = arith.constant 0 : index
    %c0_4 = arith.constant 0 : index
    %3 = vector.load %arg2[%c0_3, %c0_4] : memref<8x8xf32, #tpu.memory_space<vmem>>, vector<8x8xf32>
    %c0_5 = arith.constant 0 : index
    %c0_6 = arith.constant 0 : index
    %4 = vector.load %arg4[%c0_5, %c0_6] : memref<8x384xf32, #tpu.memory_space<vmem>>, vector<8x384xf32>
    %cst_7 = arith.constant dense<0.000000e+00> : vector<8x384xf32>
    %5 = tpu.matmul %3, %4, %cst_7 {dimension_numbers = #tpu.dot_dimension_numbers<[1], [0], [0], [1], [0, 0, 1, 1], [], []>} : vector<8x8xf32>, vector<8x384xf32>, vector<8x384xf32> -> vector<8x384xf32>
    %6 = arith.addf %2, %5 : vector<8x384xf32>
    %c0_8 = arith.constant 0 : index
    %c0_9 = arith.constant 0 : index
    %7 = vector.load %arg5[%c0_8, %c0_9] : memref<1x384xf32, #tpu.memory_space<vmem>>, vector<1x384xf32>
    %8 = vector.broadcast %7 : vector<1x384xf32> to vector<8x384xf32>
    %9 = arith.addf %6, %8 : vector<8x384xf32>
    %10 = vector.extract_strided_slice %9 {offsets = [0, 0], sizes = [8, 128], strides = [1, 1]} : vector<8x384xf32> to vector<8x128xf32>
    %11 = vector.extract_strided_slice %9 {offsets = [0, 128], sizes = [8, 128], strides = [1, 1]} : vector<8x384xf32> to vector<8x128xf32>
    %12 = arith.negf %11 : vector<8x128xf32>
    %13 = math.exp %12 : vector<8x128xf32>
    %cst_10 = arith.constant 1.000000e+00 : f32
    %14 = vector.broadcast %cst_10 : f32 to vector<8x128xf32>
    %15 = arith.addf %14, %13 : vector<8x128xf32>
    %16 = arith.divf %14, %15 : vector<8x128xf32>
    %17 = arith.mulf %10, %16 : vector<8x128xf32>
    %c0_11 = arith.constant 0 : index
    %c0_12 = arith.constant 0 : index
    %18 = vector.load %arg6[%c0_11, %c0_12] : memref<128x128xf32, #tpu.memory_space<vmem>>, vector<128x128xf32>
    %cst_13 = arith.constant dense<0.000000e+00> : vector<8x128xf32>
    %19 = tpu.matmul %17, %18, %cst_13 {dimension_numbers = #tpu.dot_dimension_numbers<[1], [0], [0], [1], [0, 0, 1, 1], [], []>} : vector<8x128xf32>, vector<128x128xf32>, vector<8x128xf32> -> vector<8x128xf32>
    %20 = vector.extract_strided_slice %9 {offsets = [0, 256], sizes = [8, 128], strides = [1, 1]} : vector<8x384xf32> to vector<8x128xf32>
    %21 = arith.addf %19, %20 : vector<8x128xf32>
    %c0_14 = arith.constant 0 : index
    %c0_15 = arith.constant 0 : index
    %22 = vector.load %arg7[%c0_14, %c0_15] : memref<8x128xf32, #tpu.memory_space<vmem>>, vector<8x128xf32>
    tpu.vector_store %arg7[%c0_14, %c0_15], %21 {strides = array<i32>} : memref<8x128xf32, #tpu.memory_space<vmem>>, vector<8x128xf32>,
    return
  }
  func.func @transform_0(%arg0: i32) -> (i32, i32) {
    %c0_i32 = arith.constant 0 : i32
    %c0_i32_0 = arith.constant 0 : i32
    return %arg0, %c0_i32 : i32, i32
  }
  func.func @transform_1(%arg0: i32) -> (i32, i32) {
    %c0_i32 = arith.constant 0 : i32
    %c0_i32_0 = arith.constant 0 : i32
    return %arg0, %c0_i32 : i32, i32
  }
  func.func @transform_2(%arg0: i32) -> (i32, i32) {
    %c0_i32 = arith.constant 0 : i32
    %c0_i32_0 = arith.constant 0 : i32
    %c0_i32_1 = arith.constant 0 : i32
    return %c0_i32, %c0_i32_0 : i32, i32
  }
  func.func @transform_3(%arg0: i32) -> (i32, i32) {
    %c0_i32 = arith.constant 0 : i32
    %c0_i32_0 = arith.constant 0 : i32
    %c0_i32_1 = arith.constant 0 : i32
    return %c0_i32, %c0_i32_0 : i32, i32
  }
  func.func @transform_4(%arg0: i32) -> (i32, i32) {
    %c0_i32 = arith.constant 0 : i32
    %c0_i32_0 = arith.constant 0 : i32
    %c0_i32_1 = arith.constant 0 : i32
    return %c0_i32, %c0_i32_0 : i32, i32
  }
  func.func @transform_5(%arg0: i32) -> (i32, i32) {
    %c0_i32 = arith.constant 0 : i32
    %c0_i32_0 = arith.constant 0 : i32
    %c0_i32_1 = arith.constant 0 : i32
    return %c0_i32, %c0_i32_0 : i32, i32
  }
  func.func @transform_6(%arg0: i32) -> (i32, i32) {
    %c0_i32 = arith.constant 0 : i32
    %c0_i32_0 = arith.constant 0 : i32
    return %arg0, %c0_i32 : i32, i32
  }
}

module attributes {stable_mosaic.version = 11 : i64} {
  func.func @kernel(%arg0: i32, %arg1: memref<8x32xf32, #tpu.memory_space<vmem>>, %arg2: memref<8x8xf32, #tpu.memory_space<vmem>>, %arg3: memref<32x384xf32, #tpu.memory_space<vmem>>, %arg4: memref<8x384xf32, #tpu.memory_space<vmem>>, %arg5: memref<1x384xf32, #tpu.memory_space<vmem>>, %arg6: memref<128x128xf32, #tpu.memory_space<vmem>>, %arg7: memref<8x128xf32, #tpu.memory_space<vmem>>) attributes {dimension_semantics = [#tpu.dimension_semantics<parallel>], iteration_bounds = array<i64: 1>, scalar_prefetch = 0 : i64, scratch_operands = 0 : i64, tpu.core_type = #tpu.core_type<tc>, window_params = [{transform_indices = @transform_0, window_bounds = array<i64: 8, 32>}, {transform_indices = @transform_1, window_bounds = array<i64: 8, 8>}, {pipeline_mode = #tpu.pipeline_mode<synchronous>, transform_indices = @transform_2, window_bounds = array<i64: 32, 384>}, {pipeline_mode = #tpu.pipeline_mode<synchronous>, transform_indices = @transform_3, window_bounds = array<i64: 8, 384>}, {pipeline_mode = #tpu.pipeline_mode<synchronous>, transform_indices = @transform_4, window_bounds = array<i64: 1, 384>}, {pipeline_mode = #tpu.pipeline_mode<synchronous>, transform_indices = @transform_5, window_bounds = array<i64: 128, 128>}, {transform_indices = @transform_6, window_bounds = array<i64: 8, 128>}]} {
    %c0 = arith.constant 0 : index
    %c0_0 = arith.constant 0 : index
    %0 = vector.load %arg1[%c0, %c0_0] : memref<8x32xf32, #tpu.memory_space<vmem>>, vector<8x32xf32>
    %c0_1 = arith.constant 0 : index
    %c0_2 = arith.constant 0 : index
    %1 = vector.load %arg3[%c0_1, %c0_2] : memref<32x384xf32, #tpu.memory_space<vmem>>, vector<32x384xf32>
    %cst = arith.constant dense<0.000000e+00> : vector<8x384xf32>
    %2 = tpu.matmul %0, %1, %cst {dimension_numbers = #tpu.dot_dimension_numbers<[1], [0], [0], [1], [0, 0, 1, 1], [], []>} : vector<8x32xf32>, vector<32x384xf32>, vector<8x384xf32> -> vector<8x384xf32>
    %c0_3 = arith.constant 0 : index
    %c0_4 = arith.constant 0 : index
    %3 = vector.load %arg2[%c0_3, %c0_4] : memref<8x8xf32, #tpu.memory_space<vmem>>, vector<8x8xf32>
    %c0_5 = arith.constant 0 : index
    %c0_6 = arith.constant 0 : index
    %4 = vector.load %arg4[%c0_5, %c0_6] : memref<8x384xf32, #tpu.memory_space<vmem>>, vector<8x384xf32>
    %cst_7 = arith.constant dense<0.000000e+00> : vector<8x384xf32>
    %5 = tpu.matmul %3, %4, %cst_7 {dimension_numbers = #tpu.dot_dimension_numbers<[1], [0], [0], [1], [0, 0, 1, 1], [], []>} : vector<8x8xf32>, vector<8x384xf32>, vector<8x384xf32> -> vector<8x384xf32>
    %6 = arith.addf %2, %5 : vector<8x384xf32>
    %c0_8 = arith.constant 0 : index
    %c0_9 = arith.constant 0 : index
    %7 = vector.load %arg5[%c0_8, %c0_9] : memref<1x384xf32, #tpu.memory_space<vmem>>, vector<1x384xf32>
    %8 = vector.broadcast %7 : vector<1x384xf32> to vector<8x384xf32>
    %9 = arith.addf %6, %8 : vector<8x384xf32>
    %10 = vector.extract_strided_slice %9 {offsets = [0, 0], sizes = [8, 128], strides = [1, 1]} : vector<8x384xf32> to vector<8x128xf32>
    %11 = vector.extract_strided_slice %9 {offsets = [0, 128], sizes = [8, 128], strides = [1, 1]} : vector<8x384xf32> to vector<8x128xf32>
    %12 = arith.negf %11 : vector<8x128xf32>
    %13 = math.exp %12 : vector<8x128xf32>
    %cst_10 = arith.constant 1.000000e+00 : f32
    %14 = vector.broadcast %cst_10 : f32 to vector<8x128xf32>
    %15 = arith.addf %14, %13 : vector<8x128xf32>
    %16 = arith.divf %14, %15 : vector<8x128xf32>
    %17 = arith.mulf %10, %16 : vector<8x128xf32>
    %c0_11 = arith.constant 0 : index
    %c0_12 = arith.constant 0 : index
    %18 = vector.load %arg6[%c0_11, %c0_12] : memref<128x128xf32, #tpu.memory_space<vmem>>, vector<128x128xf32>
    %cst_13 = arith.constant dense<0.000000e+00> : vector<8x128xf32>
    %19 = tpu.matmul %17, %18, %cst_13 {dimension_numbers = #tpu.dot_dimension_numbers<[1], [0], [0], [1], [0, 0, 1, 1], [], []>} : vector<8x128xf32>, vector<128x128xf32>, vector<8x128xf32> -> vector<8x128xf32>
    %20 = vector.extract_strided_slice %9 {offsets = [0, 256], sizes = [8, 128], strides = [1, 1]} : vector<8x384xf32> to vector<8x128xf32>
    %21 = arith.addf %19, %20 : vector<8x128xf32>
    %c0_14 = arith.constant 0 : index
    %c0_15 = arith.constant 0 : index
    %22 = vector.load %arg7[%c0_14, %c0_15] : memref<8x128xf32, #tpu.memory_space<vmem>>, vector<8x128xf32>
    tpu.vector_store %arg7[%c0_14, %c0_15], %21 {strides = array<i32>} : memref<8x128xf32, #tpu.memory_space<vmem>>, vector<8x128xf32>,
    return
  }
  func.func @transform_0(%arg0: i32) -> (i32, i32) {
    %c0_i32 = arith.constant 0 : i32
    %c0_i32_0 = arith.constant 0 : i32
    return %arg0, %c0_i32 : i32, i32
  }
  func.func @transform_1(%arg0: i32) -> (i32, i32) {
    %c0_i32 = arith.constant 0 : i32
    %c0_i32_0 = arith.constant 0 : i32
    return %arg0, %c0_i32 : i32, i32
  }
  func.func @transform_2(%arg0: i32) -> (i32, i32) {
    %c0_i32 = arith.constant 0 : i32
    %c0_i32_0 = arith.constant 0 : i32
    %c0_i32_1 = arith.constant 0 : i32
    return %c0_i32, %c0_i32_0 : i32, i32
  }
  func.func @transform_3(%arg0: i32) -> (i32, i32) {
    %c0_i32 = arith.constant 0 : i32
    %c0_i32_0 = arith.constant 0 : i32
    %c0_i32_1 = arith.constant 0 : i32
    return %c0_i32, %c0_i32_0 : i32, i32
  }
  func.func @transform_4(%arg0: i32) -> (i32, i32) {
    %c0_i32 = arith.constant 0 : i32
    %c0_i32_0 = arith.constant 0 : i32
    %c0_i32_1 = arith.constant 0 : i32
    return %c0_i32, %c0_i32_0 : i32, i32
  }
  func.func @transform_5(%arg0: i32) -> (i32, i32) {
    %c0_i32 = arith.constant 0 : i32
    %c0_i32_0 = arith.constant 0 : i32
    %c0_i32_1 = arith.constant 0 : i32
    return %c0_i32, %c0_i32_0 : i32, i32
  }
  func.func @transform_6(%arg0: i32) -> (i32, i32) {
    %c0_i32 = arith.constant 0 : i32
    %c0_i32_0 = arith.constant 0 : i32
    return %arg0, %c0_i32 : i32, i32
  }
}

</mosaic_0001>

<bundles_post_ra>
// kernel: tpu_custom_call.1
= control target key start
LH: loop header
LB: loop body
LE: loop exit
PB: predicated region body
PF: predicated region fallthrough
CT: control target
= control target key end

     0   :  { %11 = vsyncpa [#allocation3], 0  ;;  %s570_s0 = inlined_call_operand.hbm [shape: f32[8,32], index: 0, kind: input, shape index: {}]   ;;  %s571_s1 = inlined_call_operand.hbm [shape: f32[8,8], index: 1, kind: input, shape index: {}]   ;;  %s572_s2 = inlined_call_operand.hbm [shape: f32[32,384], index: 2, kind: input, shape index: {}]   ;;  %s573_s3 = inlined_call_operand.hbm [shape: f32[8,384], index: 3, kind: input, shape index: {}]   ;;  %s574_s4 = inlined_call_operand.vmem [shape: f32[1,384], index: 4, kind: input, shape index: {}]   ;;  %s575_s5 = inlined_call_operand.hbm [shape: f32[128,128], index: 5, kind: input, shape index: {}]   ;;  %s576_s6 = inlined_call_operand.hbm [shape: f32[8,128], index: 6, kind: output, shape index: {}]  }
   0x1   :  { %12 = vsyncpa [#allocation6], 0 }
   0x2   :  { %13 = vsyncpa [#allocation9], 0  ;;  %s31_s23 = sshll.u32 %s571_s1, 4  ;;  %s32_s23 = int_to_ptr.hbm [resolvable:$true] %s31_s23 }
   0x3   :  { %14 = vsyncpa [#allocation4], 0  ;;  %s501_s24 = smov [#allocation5]   ;;  %s55_s28 = sshll.u32 %s573_s3, 4  ;;  %s56_s28 = int_to_ptr.hbm [resolvable:$true] %s55_s28 }
   0x4   :  { %s33_s25 = sshll.u32 %s501_s24, 4  ;;  %s502_s29 = smov [#allocation8]   ;;  %s34_s25 = int_to_ptr.vmem [resolvable:$true] %s33_s25 }
   0x5   :  { %36 = dma.hbm_to_vmem [thread:$0]  %s32_s23, 128, %s34_s25, [#allocation6]  }
   0x6   :  { %s57_s30 = sshll.u32 %s502_s29, 4  ;;  %s20_s9 = sshll.u32 %s570_s0, 4  ;;  %s58_s30 = int_to_ptr.vmem [resolvable:$true] %s57_s30  ;;  %s21_s9 = int_to_ptr.hbm [resolvable:$true] %s20_s9 }
   0x7   :  { %60 = dma.hbm_to_vmem [thread:$0]  %s56_s28, 384, %s58_s30, [#allocation9]  }
   0x8   :  { %s41_s11 = sshll.u32 %s572_s2, 4  ;;  %s503_s12 = smov [#allocation2]   ;;  %s42_s11 = int_to_ptr.hbm [resolvable:$true] %s41_s11 }
   0x9   :  { %s22_s13 = sshll.u32 %s503_s12, 4  ;;  %s504_s3 = smov [#allocation7]   ;;  %s23_s13 = int_to_ptr.vmem [resolvable:$true] %s22_s13 }
   0xa   :  { %25 = dma.hbm_to_vmem [thread:$0]  %s21_s9, 128, %s23_s13, [#allocation3]  }
   0xb   :  { %s43_s14 = sshll.u32 %s504_s3, 4  ;;  %s505_s15 = smov 384   ;;  %s44_s14 = int_to_ptr.vmem [resolvable:$true] %s43_s14 }
   0xc   :  { %s506_s16 = smov 24   ;;  %s67_s18 = sshll.u32 %s575_s5, 4  ;;  %s68_s18 = int_to_ptr.hbm [resolvable:$true] %s67_s18 }
   0xd   :  { %49 = dma.hbm_to_vmem [thread:$0]  %s42_s11, 1536, %s44_s14, [#allocation6], %s505_s15, %s505_s15, %s506_s16  }
   0xe   :  { %s507_s19 = smov [#allocation10]   ;;  %s508_s2 = smov 128  }
   0xf   :  { %s69_s20 = sshll.u32 %s507_s19, 4  ;;  %s509_s21 = smov 8   ;;  %s70_s20 = int_to_ptr.vmem [resolvable:$true] %s69_s20 }
  0x10   :  { %75 = dma.hbm_to_vmem [thread:$0]  %s68_s18, 2048, %s70_s20, [#allocation9], %s508_s2, %s508_s2, %s509_s21  }
  0x11   :  { %493 = dma.done.wait [#allocation3], 128  }
  0x12   :  { %494 = vsyncadd [#allocation3], 4294967168 }
  0x13   :  { %495 = dma.done.wait [#allocation6], 1664  }
  0x14   :  { %496 = vsyncadd [#allocation6], 4294965632 }
  0x15   :  { %497 = dma.done.wait [#allocation9], 2432  }
  0x16   :  { %498 = vsyncadd [#allocation9], 4294964864  ;;  %vm113_vm0 = vcmask 64512   ;;  %v110_v0 = vld [vmem:[#allocation8] sm:$0xff]  ;;  %v112_v1 = vld [vmem:[#allocation8 + $0x10] sm:$0xff]  ;;  %vm177_vm1 = vcmask 261120  }
  0x17   :  { %v109_v2 = vld [vmem:[#allocation5] sm:$0xff]  ;;  %132 = vmatpush.msra.mxu0 %v110_v0  ;;  %172 = vmatpush.msra.mxu3 %v112_v1  ;;  %v107_v3 = vld [vmem:[#allocation7 + $0x50] sm:$0xff]  ;;  %v106_v4 = vld [vmem:[#allocation7 + $0x48] sm:$0xff]  ;;  %s316_s26 = sshll.u32 %s576_s6, 4  ;;  %s317_s26 = int_to_ptr.hbm [resolvable:$true] %s316_s26 }
  0x18   :  { %328 = vmatmul.msk.f32.vlgmr.msra.gmra.mxu0 %vm113_vm0, %v109_v2  ;;  %330 = vmatmul.msk.f32.vlgmr.msra.gmra.mxu3 %vm113_vm0, %v109_v2  ;;  %v104_v5 = vld [vmem:[#allocation7 + $0x38] sm:$0xff]  ;;  %v103_v6 = vld [vmem:[#allocation7 + $0x30] sm:$0xff]  ;;  %v111_v7 = vld [vmem:[#allocation8 + $0x8] sm:$0xff] }
  0x19   :  { %213 = vmatpush.msrb.mxu0 %v107_v3  ;;  %193 = vmatpush.msrb.mxu3 %v106_v4  ;;  %v101_v8 = vld [vmem:[#allocation7 + $0x20] sm:$0xff]  ;;  %v100_v9 = vld [vmem:[#allocation7 + $0x18] sm:$0xff]  ;;  %v98_v11 = vld [vmem:[#allocation7 + $0x8] sm:$0xff] }
  0x1a   :  { %152 = vmatpush.msra.mxu1 %v111_v7  ;;  %v108_v10 = vld [vmem:[#allocation7 + $0x58] sm:$0xff]  ;;  %v97_v12 = vld [vmem:[#allocation7] sm:$0xff]  ;;  %v96_v13 = vld [vmem:[#allocation2] sm:$0xff] }
  0x1b   :  { %214 = vmatpush.msrb.mxu0 %v104_v5  ;;  %194 = vmatpush.msrb.mxu3 %v103_v6  ;;  %v105_v14 = vld [vmem:[#allocation7 + $0x40] sm:$0xff]  ;;  %v102_v15 = vld [vmem:[#allocation7 + $0x28] sm:$0xff]  ;;  %v99_v16 = vld [vmem:[#allocation7 + $0x10] sm:$0xff] }
  0x1c   :  { %329 = vmatmul.msk.f32.vlgmr.msra.gmra.mxu1 %vm113_vm0, %v109_v2  ;;  %v287_v17 = vld [vmem:[#allocation10 + $0x78] sm:$0xff]  ;;  %v286_v18 = vld [vmem:[#allocation10 + $0x70] sm:$0xff]  ;;  %v285_v19 = vld [vmem:[#allocation10 + $0x68] sm:$0xff] }
  0x1d   :  { %215 = vmatpush.msrb.mxu0 %v101_v8  ;;  %195 = vmatpush.msrb.mxu3 %v100_v9  ;;  %v284_v20 = vld [vmem:[#allocation10 + $0x60] sm:$0xff]  ;;  %v283_v21 = vld [vmem:[#allocation10 + $0x58] sm:$0xff]  ;;  %v282_v22 = vld [vmem:[#allocation10 + $0x50] sm:$0xff] }
  0x1e   :  { %233 = vmatpush.msrb.mxu1 %v108_v10  ;;  %288 = vmatpush.msra.mxu2 %v287_v17  ;;  %v281_v23 = vld [vmem:[#allocation10 + $0x48] sm:$0xff]  ;;  %v280_v24 = vld [vmem:[#allocation10 + $0x40] sm:$0xff]  ;;  %v279_v25 = vld [vmem:[#allocation10 + $0x38] sm:$0xff] }
  0x1f   :  { %216 = vmatpush.msrb.mxu0 %v98_v11  ;;  %196 = vmatpush.msrb.mxu3 %v97_v12  ;;  %v278_v26 = vld [vmem:[#allocation10 + $0x30] sm:$0xff]  ;;  %v277_v27 = vld [vmem:[#allocation10 + $0x28] sm:$0xff]  ;;  %v276_v28 = vld [vmem:[#allocation10 + $0x20] sm:$0xff] }
  0x20   :  { %331 = vmatmul.msk.f32.vlgmr.msrb.gmra.mxu3 %vm177_vm1, %v96_v13  ;;  %332 = vmatmul.msk.f32.vlgmr.msrb.gmra.mxu0 %vm177_vm1, %v96_v13  ;;  %v275_v30 = vld [vmem:[#allocation10 + $0x18] sm:$0xff]  ;;  %v274_v31 = vld [vmem:[#allocation10 + $0x10] sm:$0xff]  ;;  %v273_v33 = vld [vmem:[#allocation10 + $0x8] sm:$0xff] }
  0x21   :  { %234 = vmatpush.msrb.mxu1 %v105_v14  ;;  %289 = vmatpush.msra.mxu2 %v286_v18  ;;  %v241_v32 = vld [vmem:[%s574_s4] sm:$0x7]  ;;  %v272_v36 = vld [vmem:[#allocation10] sm:$0xff]  ;;  %s510_s4 = smov [#allocation11]  }
  0x22   :  { %v244_v35 = vperm.slane %v241_v32, 1  ;;  %v245_v41 = vperm.slane %v241_v32, 2  ;;  %v243_v52 = vperm.slane %v241_v32, 0  ;;  %s314_s23 = sshll.u32 %s510_s4, 4  ;;  %s315_s23 = int_to_ptr.vmem [resolvable:$true] %s314_s23 }
  0x23   :  { %235 = vmatpush.msrb.mxu1 %v102_v15  ;;  %290 = vmatpush.msra.mxu2 %v285_v19 }
  0x25   :  { %236 = vmatpush.msrb.mxu1 %v99_v16  ;;  %291 = vmatpush.msra.mxu2 %v284_v20 }
  0x26   :  { %333 = vmatmul.msk.f32.vlgmr.msrb.gmra.mxu1 %vm177_vm1, %v96_v13 }
  0x27   :  { %292 = vmatpush.msra.mxu2 %v283_v21 }
  0x29   :  { %293 = vmatpush.msra.mxu2 %v282_v22 }
  0x2b   :  { %294 = vmatpush.msra.mxu2 %v281_v23 }
  0x2d   :  { %295 = vmatpush.msra.mxu2 %v280_v24 }
  0x2f   :  { %296 = vmatpush.msra.mxu2 %v279_v25 }
  0x31   :  { %297 = vmatpush.msra.mxu2 %v278_v26 }
  0x33   :  { %298 = vmatpush.msra.mxu2 %v277_v27 }
  0x35   :  { %299 = vmatpush.msra.mxu2 %v276_v28 }
  0x37   :  { %300 = vmatpush.msra.mxu2 %v275_v30 }
  0x39   :  { %301 = vmatpush.msra.mxu2 %v274_v31 }
  0x3b   :  { %302 = vmatpush.msra.mxu2 %v273_v33 }
  0x3d   :  { %303 = vmatpush.msra.mxu2 %v272_v36 }
  0x95   :  { %v134_v29 = vpop.f32.mrf.mxu0 }
  0x99   :  { %v154_v34 = vpop.f32.mrf.mxu1 }
  0x9b   :  { %v174_v42 = vpop.f32.mrf.mxu3 }
  0x9d   :  { %v218_v37 = vpop.f32.mrf.mxu0 }
  0x9e   :  { %v219_v38 = vadd.f32 %v218_v37, %v154_v34 }
  0xa0   :  { %v250_v39 = vadd.f32 %v244_v35, %v219_v38 }
  0xa2   :  { %v334_v40 = vmul.f32 -1.442695, %v250_v39 }
  0xa3   :  { %v238_v43 = vpop.f32.mrf.mxu1  ;;  %v198_v50 = vpop.f32.mrf.mxu3 }
  0xa4   :  { %345 = vpow2.f32 %v334_v40  ;;  %v239_v44 = vadd.f32 %v238_v43, %v174_v42  ;;  %v199_v54 = vadd.f32 %v198_v50, %v134_v29 }
  0xa6   :  { %v251_v45 = vadd.f32 %v245_v41, %v239_v44  ;;  %v249_v59 = vadd.f32 %v243_v52, %v199_v54 }
  0xaa   :  { %v346_v46 = vpop.eup %345 }
  0xab   :  { %v255_v47 = vadd.f32 1.0, %v346_v46 }
  0xad   :  { %347 = vrcp.f32 %v255_v47  ;;  %v267_v53 = vand.u32 2147483648, %v255_v47  ;;  %v265_v56 = vand.u32 2147483647, %v255_v47  ;;  %vm261_vm3 = vweird.f32 %v255_v47 }
  0xaf   :  { %v268_v58 = vor.u32 1.1754944e-38, %v267_v53  ;;  %vm266_vm5 = vcmp.eq.f32.partialorder %v265_v56, 8.507059e+37 }
  0xb3   :  { %v348_v48 = vpop.eup %347 }
  0xb4   :  { %v257_v49 = vmul.f32 %v348_v48, %v255_v47  ;;  %vm262_vm2 = vweird.f32 %v348_v48 }
  0xb5   :  { %vm263_vm4 = vmor %vm261_vm3, %vm262_vm2 }
  0xb6   :  { %v258_v51 = vsub.f32 1.0, %v257_v49 }
  0xb8   :  { %v259_v55 = vmul.f32 %v348_v48, %v258_v51 }
  0xba   :  { %v260_v57 = vadd.f32 %v348_v48, %v259_v55 }
  0xbc   :  { %v264_v60 = vsel %vm263_vm4, %v348_v48, %v260_v57 }
  0xbd   :  { %v269_v61 = vsel %vm266_vm5, %v268_v58, %v264_v60 }
  0xbe   :  { %v271_v62 = vmul.f32 %v269_v61, %v249_v59 }
  0xc0   :  { %304 = vmatmul.f32.vlgmr.msra.gmra.mxu2 %v271_v62 }
 0x143   :  { %v305_v63 = vpop.f32.mrf.mxu2 }
 0x144   :  { %v306_v0 = vadd.f32 %v305_v63, %v251_v45 }
 0x146   :  { %308 = vst [vmem:[#allocation11] sm:$0xff] %v306_v0 }
 0x147   :  { %319 = dma.vmem_to_hbm [thread:$0]  %s315_s23, 128, %s317_s26, [#allocation4]  }
 0x148   :  { %499 = dma.done.wait [#allocation4], 128  }
 0x149   :  { %500 = vsyncadd [#allocation4], 4294967168 }
 0x14a   :  { %324 = vsyncpa [#allocation3], 1 }
 0x14b   :  { %325 = vsyncpa [#allocation6], 1 }
 0x14c   :  { %326 = vsyncpa [#allocation9], 1 }
 0x14d   :  { %327 = vsyncpa [#allocation4], 1 }

// kernel: tpu_custom_call.1
= control target key start
LH: loop header
LB: loop body
LE: loop exit
PB: predicated region body
PF: predicated region fallthrough
CT: control target
= control target key end

     0   :  { %11 = vsyncpa [#allocation3], 0  ;;  %s570_s0 = inlined_call_operand.hbm [shape: f32[8,32], index: 0, kind: input, shape index: {}]   ;;  %s571_s1 = inlined_call_operand.hbm [shape: f32[8,8], index: 1, kind: input, shape index: {}]   ;;  %s572_s2 = inlined_call_operand.hbm [shape: f32[32,384], index: 2, kind: input, shape index: {}]   ;;  %s573_s3 = inlined_call_operand.hbm [shape: f32[8,384], index: 3, kind: input, shape index: {}]   ;;  %s574_s4 = inlined_call_operand.vmem [shape: f32[1,384], index: 4, kind: input, shape index: {}]   ;;  %s575_s5 = inlined_call_operand.hbm [shape: f32[128,128], index: 5, kind: input, shape index: {}]   ;;  %s576_s6 = inlined_call_operand.hbm [shape: f32[8,128], index: 6, kind: output, shape index: {}]  }
   0x1   :  { %12 = vsyncpa [#allocation6], 0 }
   0x2   :  { %13 = vsyncpa [#allocation9], 0  ;;  %s31_s23 = sshll.u32 %s571_s1, 4  ;;  %s32_s23 = int_to_ptr.hbm [resolvable:$true] %s31_s23 }
   0x3   :  { %14 = vsyncpa [#allocation4], 0  ;;  %s501_s24 = smov [#allocation5]   ;;  %s55_s28 = sshll.u32 %s573_s3, 4  ;;  %s56_s28 = int_to_ptr.hbm [resolvable:$true] %s55_s28 }
   0x4   :  { %s33_s25 = sshll.u32 %s501_s24, 4  ;;  %s502_s29 = smov [#allocation8]   ;;  %s34_s25 = int_to_ptr.vmem [resolvable:$true] %s33_s25 }
   0x5   :  { %36 = dma.hbm_to_vmem [thread:$0]  %s32_s23, 128, %s34_s25, [#allocation6]  }
   0x6   :  { %s57_s30 = sshll.u32 %s502_s29, 4  ;;  %s20_s9 = sshll.u32 %s570_s0, 4  ;;  %s58_s30 = int_to_ptr.vmem [resolvable:$true] %s57_s30  ;;  %s21_s9 = int_to_ptr.hbm [resolvable:$true] %s20_s9 }
   0x7   :  { %60 = dma.hbm_to_vmem [thread:$0]  %s56_s28, 384, %s58_s30, [#allocation9]  }
   0x8   :  { %s41_s11 = sshll.u32 %s572_s2, 4  ;;  %s503_s12 = smov [#allocation2]   ;;  %s42_s11 = int_to_ptr.hbm [resolvable:$true] %s41_s11 }
   0x9   :  { %s22_s13 = sshll.u32 %s503_s12, 4  ;;  %s504_s3 = smov [#allocation7]   ;;  %s23_s13 = int_to_ptr.vmem [resolvable:$true] %s22_s13 }
   0xa   :  { %25 = dma.hbm_to_vmem [thread:$0]  %s21_s9, 128, %s23_s13, [#allocation3]  }
   0xb   :  { %s43_s14 = sshll.u32 %s504_s3, 4  ;;  %s505_s15 = smov 384   ;;  %s44_s14 = int_to_ptr.vmem [resolvable:$true] %s43_s14 }
   0xc   :  { %s506_s16 = smov 24   ;;  %s67_s18 = sshll.u32 %s575_s5, 4  ;;  %s68_s18 = int_to_ptr.hbm [resolvable:$true] %s67_s18 }
   0xd   :  { %49 = dma.hbm_to_vmem [thread:$0]  %s42_s11, 1536, %s44_s14, [#allocation6], %s505_s15, %s505_s15, %s506_s16  }
   0xe   :  { %s507_s19 = smov [#allocation10]   ;;  %s508_s2 = smov 128  }
   0xf   :  { %s69_s20 = sshll.u32 %s507_s19, 4  ;;  %s509_s21 = smov 8   ;;  %s70_s20 = int_to_ptr.vmem [resolvable:$true] %s69_s20 }
  0x10   :  { %75 = dma.hbm_to_vmem [thread:$0]  %s68_s18, 2048, %s70_s20, [#allocation9], %s508_s2, %s508_s2, %s509_s21  }
  0x11   :  { %493 = dma.done.wait [#allocation3], 128  }
  0x12   :  { %494 = vsyncadd [#allocation3], 4294967168 }
  0x13   :  { %495 = dma.done.wait [#allocation6], 1664  }
  0x14   :  { %496 = vsyncadd [#allocation6], 4294965632 }
  0x15   :  { %497 = dma.done.wait [#allocation9], 2432  }
  0x16   :  { %498 = vsyncadd [#allocation9], 4294964864  ;;  %vm113_vm0 = vcmask 64512   ;;  %v110_v0 = vld [vmem:[#allocation8] sm:$0xff]  ;;  %v112_v1 = vld [vmem:[#allocation8 + $0x10] sm:$0xff]  ;;  %vm177_vm1 = vcmask 261120  }
  0x17   :  { %v109_v2 = vld [vmem:[#allocation5] sm:$0xff]  ;;  %132 = vmatpush.msra.mxu0 %v110_v0  ;;  %172 = vmatpush.msra.mxu3 %v112_v1  ;;  %v107_v3 = vld [vmem:[#allocation7 + $0x50] sm:$0xff]  ;;  %v106_v4 = vld [vmem:[#allocation7 + $0x48] sm:$0xff]  ;;  %s316_s26 = sshll.u32 %s576_s6, 4  ;;  %s317_s26 = int_to_ptr.hbm [resolvable:$true] %s316_s26 }
  0x18   :  { %328 = vmatmul.msk.f32.vlgmr.msra.gmra.mxu0 %vm113_vm0, %v109_v2  ;;  %330 = vmatmul.msk.f32.vlgmr.msra.gmra.mxu3 %vm113_vm0, %v109_v2  ;;  %v104_v5 = vld [vmem:[#allocation7 + $0x38] sm:$0xff]  ;;  %v103_v6 = vld [vmem:[#allocation7 + $0x30] sm:$0xff]  ;;  %v111_v7 = vld [vmem:[#allocation8 + $0x8] sm:$0xff] }
  0x19   :  { %213 = vmatpush.msrb.mxu0 %v107_v3  ;;  %193 = vmatpush.msrb.mxu3 %v106_v4  ;;  %v101_v8 = vld [vmem:[#allocation7 + $0x20] sm:$0xff]  ;;  %v100_v9 = vld [vmem:[#allocation7 + $0x18] sm:$0xff]  ;;  %v98_v11 = vld [vmem:[#allocation7 + $0x8] sm:$0xff] }
  0x1a   :  { %152 = vmatpush.msra.mxu1 %v111_v7  ;;  %v108_v10 = vld [vmem:[#allocation7 + $0x58] sm:$0xff]  ;;  %v97_v12 = vld [vmem:[#allocation7] sm:$0xff]  ;;  %v96_v13 = vld [vmem:[#allocation2] sm:$0xff] }
  0x1b   :  { %214 = vmatpush.msrb.mxu0 %v104_v5  ;;  %194 = vmatpush.msrb.mxu3 %v103_v6  ;;  %v105_v14 = vld [vmem:[#allocation7 + $0x40] sm:$0xff]  ;;  %v102_v15 = vld [vmem:[#allocation7 + $0x28] sm:$0xff]  ;;  %v99_v16 = vld [vmem:[#allocation7 + $0x10] sm:$0xff] }
  0x1c   :  { %329 = vmatmul.msk.f32.vlgmr.msra.gmra.mxu1 %vm113_vm0, %v109_v2  ;;  %v287_v17 = vld [vmem:[#allocation10 + $0x78] sm:$0xff]  ;;  %v286_v18 = vld [vmem:[#allocation10 + $0x70] sm:$0xff]  ;;  %v285_v19 = vld [vmem:[#allocation10 + $0x68] sm:$0xff] }
  0x1d   :  { %215 = vmatpush.msrb.mxu0 %v101_v8  ;;  %195 = vmatpush.msrb.mxu3 %v100_v9  ;;  %v284_v20 = vld [vmem:[#allocation10 + $0x60] sm:$0xff]  ;;  %v283_v21 = vld [vmem:[#allocation10 + $0x58] sm:$0xff]  ;;  %v282_v22 = vld [vmem:[#allocation10 + $0x50] sm:$0xff] }
  0x1e   :  { %233 = vmatpush.msrb.mxu1 %v108_v10  ;;  %288 = vmatpush.msra.mxu2 %v287_v17  ;;  %v281_v23 = vld [vmem:[#allocation10 + $0x48] sm:$0xff]  ;;  %v280_v24 = vld [vmem:[#allocation10 + $0x40] sm:$0xff]  ;;  %v279_v25 = vld [vmem:[#allocation10 + $0x38] sm:$0xff] }
  0x1f   :  { %216 = vmatpush.msrb.mxu0 %v98_v11  ;;  %196 = vmatpush.msrb.mxu3 %v97_v12  ;;  %v278_v26 = vld [vmem:[#allocation10 + $0x30] sm:$0xff]  ;;  %v277_v27 = vld [vmem:[#allocation10 + $0x28] sm:$0xff]  ;;  %v276_v28 = vld [vmem:[#allocation10 + $0x20] sm:$0xff] }
  0x20   :  { %331 = vmatmul.msk.f32.vlgmr.msrb.gmra.mxu3 %vm177_vm1, %v96_v13  ;;  %332 = vmatmul.msk.f32.vlgmr.msrb.gmra.mxu0 %vm177_vm1, %v96_v13  ;;  %v275_v30 = vld [vmem:[#allocation10 + $0x18] sm:$0xff]  ;;  %v274_v31 = vld [vmem:[#allocation10 + $0x10] sm:$0xff]  ;;  %v273_v33 = vld [vmem:[#allocation10 + $0x8] sm:$0xff] }
  0x21   :  { %234 = vmatpush.msrb.mxu1 %v105_v14  ;;  %289 = vmatpush.msra.mxu2 %v286_v18  ;;  %v241_v32 = vld [vmem:[%s574_s4] sm:$0x7]  ;;  %v272_v36 = vld [vmem:[#allocation10] sm:$0xff]  ;;  %s510_s4 = smov [#allocation11]  }
  0x22   :  { %v244_v35 = vperm.slane %v241_v32, 1  ;;  %v245_v41 = vperm.slane %v241_v32, 2  ;;  %v243_v52 = vperm.slane %v241_v32, 0  ;;  %s314_s23 = sshll.u32 %s510_s4, 4  ;;  %s315_s23 = int_to_ptr.vmem [resolvable:$true] %s314_s23 }
  0x23   :  { %235 = vmatpush.msrb.mxu1 %v102_v15  ;;  %290 = vmatpush.msra.mxu2 %v285_v19 }
  0x25   :  { %236 = vmatpush.msrb.mxu1 %v99_v16  ;;  %291 = vmatpush.msra.mxu2 %v284_v20 }
  0x26   :  { %333 = vmatmul.msk.f32.vlgmr.msrb.gmra.mxu1 %vm177_vm1, %v96_v13 }
  0x27   :  { %292 = vmatpush.msra.mxu2 %v283_v21 }
  0x29   :  { %293 = vmatpush.msra.mxu2 %v282_v22 }
  0x2b   :  { %294 = vmatpush.msra.mxu2 %v281_v23 }
  0x2d   :  { %295 = vmatpush.msra.mxu2 %v280_v24 }
  0x2f   :  { %296 = vmatpush.msra.mxu2 %v279_v25 }
  0x31   :  { %297 = vmatpush.msra.mxu2 %v278_v26 }
  0x33   :  { %298 = vmatpush.msra.mxu2 %v277_v27 }
  0x35   :  { %299 = vmatpush.msra.mxu2 %v276_v28 }
  0x37   :  { %300 = vmatpush.msra.mxu2 %v275_v30 }
  0x39   :  { %301 = vmatpush.msra.mxu2 %v274_v31 }
  0x3b   :  { %302 = vmatpush.msra.mxu2 %v273_v33 }
  0x3d   :  { %303 = vmatpush.msra.mxu2 %v272_v36 }
  0x95   :  { %v134_v29 = vpop.f32.mrf.mxu0 }
  0x99   :  { %v154_v34 = vpop.f32.mrf.mxu1 }
  0x9b   :  { %v174_v42 = vpop.f32.mrf.mxu3 }
  0x9d   :  { %v218_v37 = vpop.f32.mrf.mxu0 }
  0x9e   :  { %v219_v38 = vadd.f32 %v218_v37, %v154_v34 }
  0xa0   :  { %v250_v39 = vadd.f32 %v244_v35, %v219_v38 }
  0xa2   :  { %v334_v40 = vmul.f32 -1.442695, %v250_v39 }
  0xa3   :  { %v238_v43 = vpop.f32.mrf.mxu1  ;;  %v198_v50 = vpop.f32.mrf.mxu3 }
  0xa4   :  { %345 = vpow2.f32 %v334_v40  ;;  %v239_v44 = vadd.f32 %v238_v43, %v174_v42  ;;  %v199_v54 = vadd.f32 %v198_v50, %v134_v29 }
  0xa6   :  { %v251_v45 = vadd.f32 %v245_v41, %v239_v44  ;;  %v249_v59 = vadd.f32 %v243_v52, %v199_v54 }
  0xaa   :  { %v346_v46 = vpop.eup %345 }
  0xab   :  { %v255_v47 = vadd.f32 1.0, %v346_v46 }
  0xad   :  { %347 = vrcp.f32 %v255_v47  ;;  %v267_v53 = vand.u32 2147483648, %v255_v47  ;;  %v265_v56 = vand.u32 2147483647, %v255_v47  ;;  %vm261_vm3 = vweird.f32 %v255_v47 }
  0xaf   :  { %v268_v58 = vor.u32 1.1754944e-38, %v267_v53  ;;  %vm266_vm5 = vcmp.eq.f32.partialorder %v265_v56, 8.507059e+37 }
  0xb3   :  { %v348_v48 = vpop.eup %347 }
  0xb4   :  { %v257_v49 = vmul.f32 %v348_v48, %v255_v47  ;;  %vm262_vm2 = vweird.f32 %v348_v48 }
  0xb5   :  { %vm263_vm4 = vmor %vm261_vm3, %vm262_vm2 }
  0xb6   :  { %v258_v51 = vsub.f32 1.0, %v257_v49 }
  0xb8   :  { %v259_v55 = vmul.f32 %v348_v48, %v258_v51 }
  0xba   :  { %v260_v57 = vadd.f32 %v348_v48, %v259_v55 }
  0xbc   :  { %v264_v60 = vsel %vm263_vm4, %v348_v48, %v260_v57 }
  0xbd   :  { %v269_v61 = vsel %vm266_vm5, %v268_v58, %v264_v60 }
  0xbe   :  { %v271_v62 = vmul.f32 %v269_v61, %v249_v59 }
  0xc0   :  { %304 = vmatmul.f32.vlgmr.msra.gmra.mxu2 %v271_v62 }
 0x143   :  { %v305_v63 = vpop.f32.mrf.mxu2 }
 0x144   :  { %v306_v0 = vadd.f32 %v305_v63, %v251_v45 }
 0x146   :  { %308 = vst [vmem:[#allocation11] sm:$0xff] %v306_v0 }
 0x147   :  { %319 = dma.vmem_to_hbm [thread:$0]  %s315_s23, 128, %s317_s26, [#allocation4]  }
 0x148   :  { %499 = dma.done.wait [#allocation4], 128  }
 0x149   :  { %500 = vsyncadd [#allocation4], 4294967168 }
 0x14a   :  { %324 = vsyncpa [#allocation3], 1 }
 0x14b   :  { %325 = vsyncpa [#allocation6], 1 }
 0x14c   :  { %326 = vsyncpa [#allocation9], 1 }
 0x14d   :  { %327 = vsyncpa [#allocation4], 1 }

</bundles_post_ra>
